<compile_context>
chip_gen: v5e
topology: v5e:2x2
jax: 0.10.0
libtpu: 0.0.40
codegen_flags: <defaults>
</compile_context>

<pallas_src>
import functools

import jax
import jax.numpy as jnp
from jax.experimental import pallas as pl
from jax.experimental.pallas import tpu as pltpu


_NEG_LARGE = -1e30  # finite "-inf" for padded vocab columns (avoids NaNs)


def _ceil_div(a, b):
    return -(-a // b)


def _round_up(x, m):
    return _ceil_div(x, m) * m


def _balanced_tiles(total, max_tile, align):
    """Tile `total` with tiles <= ~max_tile so per-tile pad overshoot < align."""
    max_tile = max(align, min(max_tile, _round_up(total, align)))
    n = _ceil_div(total, max_tile)
    tile = _round_up(_ceil_div(total, n), align)
    n = _ceil_div(total, tile)
    return tile, n, n * tile


@functools.lru_cache(maxsize=None)
def _vmem_budget_bytes():
    """Scoped-VMEM budget with headroom; v7x has only 64 MiB physical per TC."""
    try:
        cap = int(pltpu.get_tpu_info().vmem_capacity_bytes)
    except Exception:
        cap = 64 * 1024 * 1024  # conservative fallback (v7x per-TC VMEM)
    return min(int(cap * 0.7), 96 * 1024 * 1024)


def _main_tiles_fit(tm, tv, E, budget):
    need = (2 * tm * E * 2          # feat tile, bf16, double-buffered
            + 2 * E * tv * 2        # weight tile, bf16, double-buffered
            + 2 * 8 * tv * 4        # bias tile (sublane-padded to 8), f32
            + 2 * tm * tv * 4       # logits output tile, f32
            + 4 * tm * 128 * 4)     # lse output + m/s scratch (lane-padded)
    return need <= budget


def _proj_lse_kernel(feat_ref, w_ref, b_ref, logits_ref, lse_ref, m_sc, s_sc):
    """One (row-tile, vocab-tile) step.

    logits_block = feat @ W[:, j] + b[j]   (MXU, bf16 inputs, f32 accumulate)
    Online update of running max / running sum-of-exp in VMEM scratch; on the
    last vocab tile emit lse = m + log(s) per row.
    """
    j = pl.program_id(1)

    @pl.when(j == 0)
    def _():
        m_sc[...] = jnp.full_like(m_sc, -jnp.inf)
        s_sc[...] = jnp.zeros_like(s_sc)

    logits = jnp.dot(feat_ref[...], w_ref[...],
                     preferred_element_type=jnp.float32) + b_ref[...]
    logits_ref[...] = logits

    m_prev = m_sc[...]
    m_new = jnp.maximum(m_prev, jnp.max(logits, axis=-1, keepdims=True))
    alpha = jnp.exp(m_prev - m_new)
    s_sc[...] = alpha * s_sc[...] + jnp.sum(jnp.exp(logits - m_new),
                                            axis=-1, keepdims=True)
    m_sc[...] = m_new

    @pl.when(j == pl.num_programs(1) - 1)
    def _():
        lse_ref[...] = m_sc[...] + jnp.log(s_sc[...])


def _normalize_kernel(logits_ref, lse_ref, out_ref, *, log_probs):
    """(log_)softmax finalize: out = logits - lse (exp'd for probs)."""
    y = logits_ref[...] - lse_ref[...]
    out_ref[...] = y if log_probs else jnp.exp(y)


@functools.partial(jax.jit, static_argnames=("tm", "tv"))
def incremental_decoder_forward(prev_output_tokens, embed_table, out_w, out_b,
                                *, tm=256, tv=1024):
    """
    prev_output_tokens: (B, T) int32
    embed_table:        (V, E) f32
    out_w:              (E, V) f32   (output projection)
    out_b:              (V,)   f32

    Returns (logits [B, T, V] f32, {"lse": [B, T, 1] f32}) mirroring
    FairseqDecoder.forward -> (x, extra).
    """
    B, T = prev_output_tokens.shape
    V, E = embed_table.shape
    M = B * T

    budget = _vmem_budget_bytes()
    # Shrink requested tiles until the double-buffered working set fits VMEM.
    while tv > 128 and not _main_tiles_fit(tm, tv, E, budget):
        tv //= 2
    while tm > 8 and not _main_tiles_fit(tm, tv, E, budget):
        tm //= 2

    # Balanced tiling: per-tile pad overshoot < 8 rows / < 128 vocab columns.
    tm_eff, n_row, M_pad = _balanced_tiles(M, tm, 8)
    tv_eff, n_voc, V_pad = _balanced_tiles(V, tv, 128)

    # extract_features: embedding lookup (gather glue, plain JAX), bf16 operand.
    # TODO(synk): fuse the gather into the kernel via scalar-prefetched token
    #             ids + pl.Element row index_map to skip the (M, E) HBM slab.
    feats = jnp.take(embed_table, prev_output_tokens.reshape(-1), axis=0)
    feats = feats.astype(jnp.bfloat16)
    if M_pad != M:
        feats = jnp.pad(feats, ((0, M_pad - M), (0, 0)))

    # output_layer weights, bf16 operands (f32 MXU accumulate in-kernel).
    # TODO(synk): int8 (v5e/v6e) / fp8-e4m3 (v7x) weight quantization would
    #             halve the dominant E*V weight stream for T=1 decode.
    w = out_w.astype(jnp.bfloat16)                        # (E, V) bf16
    b = out_b.astype(jnp.float32).reshape(1, V)           # (1, V) f32
    if V_pad != V:
        w = jnp.pad(w, ((0, 0), (0, V_pad - V)))
        b = jnp.pad(b, ((0, 0), (0, V_pad - V)), constant_values=_NEG_LARGE)

    cost = pl.CostEstimate(
        flops=2 * M_pad * V_pad * E,
        transcendentals=M_pad * V_pad,                    # online-LSE exps
        bytes_accessed=(M_pad * E * 2 + E * V_pad * 2 + V_pad * 4
                        + M_pad * V_pad * 4 + M_pad * 4),
    )

    logits_pad, lse_pad = pl.pallas_call(
        _proj_lse_kernel,
        out_shape=(
            jax.ShapeDtypeStruct((M_pad, V_pad), jnp.float32),
            jax.ShapeDtypeStruct((M_pad, 1), jnp.float32),
        ),
        grid_spec=pltpu.PrefetchScalarGridSpec(
            num_scalar_prefetch=0,
            grid=(n_row, n_voc),                          # vocab (reduction) last
            in_specs=[
                pl.BlockSpec((tm_eff, E), lambda i, j: (i, 0)),     # feat rows
                pl.BlockSpec((E, tv_eff), lambda i, j: (0, j)),     # weight tile
                pl.BlockSpec((1, tv_eff), lambda i, j: (0, j)),     # bias tile
            ],
            out_specs=[
                pl.BlockSpec((tm_eff, tv_eff), lambda i, j: (i, j)),  # logits
                pl.BlockSpec((tm_eff, 1), lambda i, j: (i, 0)),       # lse (resident)
            ],
            scratch_shapes=[
                pltpu.VMEM((tm_eff, 1), jnp.float32),     # running max
                pltpu.VMEM((tm_eff, 1), jnp.float32),     # running sum-of-exp
            ],
        ),
        compiler_params=pltpu.CompilerParams(
            dimension_semantics=("parallel", "arbitrary"),
            vmem_limit_bytes=budget,
        ),
        cost_estimate=cost,
    )(feats, w, b)

    logits = logits_pad[:M, :V].reshape(B, T, V)
    lse = lse_pad[:M].reshape(B, T, 1)
    return logits, {"lse": lse}


@functools.partial(jax.jit, static_argnames=("log_probs", "tm", "tv"))
def _normalized_probs_impl(logits, lse, *, log_probs=True, tm=256, tv=2048):
    B, T, V = logits.shape
    M = B * T
    x = logits.reshape(M, V).astype(jnp.float32)
    z = lse.reshape(M, 1).astype(jnp.float32)

    budget = _vmem_budget_bytes()
    while tv > 128 and (4 * tm * tv * 4 + 4 * tm * 128 * 4) > budget:
        tv //= 2

    tm_eff, n_row, M_pad = _balanced_tiles(M, tm, 8)
    tv_eff, n_voc, V_pad = _balanced_tiles(V, tv, 128)
    if M_pad != M or V_pad != V:
        x = jnp.pad(x, ((0, M_pad - M), (0, V_pad - V)))
        z = jnp.pad(z, ((0, M_pad - M), (0, 0)))

    out = pl.pallas_call(
        functools.partial(_normalize_kernel, log_probs=log_probs),
        out_shape=jax.ShapeDtypeStruct((M_pad, V_pad), jnp.float32),
        grid_spec=pltpu.PrefetchScalarGridSpec(
            num_scalar_prefetch=0,
            grid=(n_row, n_voc),
            in_specs=[
                pl.BlockSpec((tm_eff, tv_eff), lambda i, j: (i, j)),
                pl.BlockSpec((tm_eff, 1), lambda i, j: (i, 0)),
            ],
            out_specs=pl.BlockSpec((tm_eff, tv_eff), lambda i, j: (i, j)),
        ),
        compiler_params=pltpu.CompilerParams(
            dimension_semantics=("parallel", "parallel"),
            vmem_limit_bytes=budget,
        ),
    )(x, z)
    return out[:M, :V].reshape(B, T, V)


def get_normalized_probs(net_output, log_probs=True):
    """Mirrors FairseqDecoder.get_normalized_probs, lazily (consumer-side)."""
    logits, extra = net_output
    return _normalized_probs_impl(logits, extra["lse"], log_probs=log_probs)


if __name__ == "__main__":
    # Small shapes that deliberately exercise the tail-padding paths:
    # M = 14 (not a multiple of 8), V = 300 (not a multiple of 128).
    B, T = 2, 7
    V, E = 300, 64

    key = jax.random.PRNGKey(0)
    k_tok, k_emb, k_w, k_b = jax.random.split(key, 4)

    prev_output_tokens = jax.random.randint(k_tok, (B, T), 0, V, dtype=jnp.int32)
    embed_table = jax.random.normal(k_emb, (V, E), dtype=jnp.float32) * 0.02
    out_w = jax.random.normal(k_w, (E, V), dtype=jnp.float32) * 0.02
    out_b = jax.random.normal(k_b, (V,), dtype=jnp.float32) * 0.01

    # plain-JAX f32 reference
    feats_ref = jnp.take(embed_table, prev_output_tokens.reshape(-1), axis=0)
    logits_ref = (feats_ref @ out_w + out_b).reshape(B, T, V)
    logprobs_ref = jax.nn.log_softmax(logits_ref, axis=-1)
    probs_ref = jnp.exp(logprobs_ref)

    # Run once with production defaults (tiles auto-balanced for tiny shapes)
    # and once with tiny tiles to exercise the multi-row-tile + multi-vocab-tile
    # (online log-sum-exp) code paths at this toy size.
    for kwargs in ({}, {"tm": 8, "tv": 128}):
        logits, extra = incremental_decoder_forward(
            prev_output_tokens, embed_table, out_w, out_b, **kwargs)
        logprobs = get_normalized_probs((logits, extra), log_probs=True)
        probs = get_normalized_probs((logits, extra), log_probs=False)
        jax.block_until_ready((logits, extra["lse"], logprobs, probs))

        assert logits.shape == (B, T, V)
        assert extra["lse"].shape == (B, T, 1)
        assert logprobs.shape == (B, T, V) and probs.shape == (B, T, V)
        assert jnp.allclose(logits, logits_ref, rtol=1e-2, atol=2e-3), "logits"
        assert jnp.allclose(logprobs, logprobs_ref, rtol=1e-2, atol=2e-3), "logprobs"
        assert jnp.allclose(probs, probs_ref, rtol=1e-2, atol=2e-3), "probs"
        assert jnp.allclose(jnp.sum(probs, axis=-1), 1.0, atol=1e-3)

    print("KERNEL_OK")
</pallas_src>

<mosaic_0001>
module attributes {stable_mosaic.version = 11 : i64} {
  func.func @_proj_lse_kernel(%arg0: i32, %arg1: i32, %arg2: memref<16x64xbf16, #tpu.memory_space<vmem>>, %arg3: memref<64x384xbf16, #tpu.memory_space<vmem>>, %arg4: memref<1x384xf32, #tpu.memory_space<vmem>>, %arg5: memref<16x384xf32, #tpu.memory_space<vmem>>, %arg6: memref<16x1xf32, #tpu.memory_space<vmem>>, %arg7: memref<16x1xf32, #tpu.memory_space<vmem>>, %arg8: memref<16x1xf32, #tpu.memory_space<vmem>>) attributes {dimension_semantics = [#tpu.dimension_semantics<parallel>, #tpu.dimension_semantics<arbitrary>], iteration_bounds = array<i64: 1, 1>, scalar_prefetch = 0 : i64, scratch_operands = 2 : i64, tpu.core_type = #tpu.core_type<tc>, window_params = [{transform_indices = @transform_0, window_bounds = array<i64: 16, 64>}, {transform_indices = @transform_1, window_bounds = array<i64: 64, 384>}, {transform_indices = @transform_2, window_bounds = array<i64: 1, 384>}, {transform_indices = @transform_3, window_bounds = array<i64: 16, 384>}, {transform_indices = @transform_4, window_bounds = array<i64: 16, 1>}]} {
    %c0_i32 = arith.constant 0 : i32
    %0 = arith.cmpi eq, %arg1, %c0_i32 : i32
    %1 = arith.extui %0 : i1 to i32
    %c0_i32_0 = arith.constant 0 : i32
    %2 = arith.cmpi ne, %1, %c0_i32_0 : i32
    scf.if %2 {
      %cst_20 = arith.constant 0xFF800000 : f32
      %29 = vector.broadcast %cst_20 : f32 to vector<16x1xf32>
      %c0_21 = arith.constant 0 : index
      %c0_22 = arith.constant 0 : index
      %30 = vector.load %arg7[%c0_21, %c0_22] : memref<16x1xf32, #tpu.memory_space<vmem>>, vector<16x1xf32>
      tpu.vector_store %arg7[%c0_21, %c0_22], %29 {strides = array<i32>} : memref<16x1xf32, #tpu.memory_space<vmem>>, vector<16x1xf32>,
      %cst_23 = arith.constant 0.000000e+00 : f32
      %31 = vector.broadcast %cst_23 : f32 to vector<16x1xf32>
      %c0_24 = arith.constant 0 : index
      %c0_25 = arith.constant 0 : index
      %32 = vector.load %arg8[%c0_24, %c0_25] : memref<16x1xf32, #tpu.memory_space<vmem>>, vector<16x1xf32>
      tpu.vector_store %arg8[%c0_24, %c0_25], %31 {strides = array<i32>} : memref<16x1xf32, #tpu.memory_space<vmem>>, vector<16x1xf32>,
    } else {
    }
    %c0 = arith.constant 0 : index
    %c0_1 = arith.constant 0 : index
    %3 = vector.load %arg2[%c0, %c0_1] : memref<16x64xbf16, #tpu.memory_space<vmem>>, vector<16x64xbf16>
    %c0_2 = arith.constant 0 : index
    %c0_3 = arith.constant 0 : index
    %4 = vector.load %arg3[%c0_2, %c0_3] : memref<64x384xbf16, #tpu.memory_space<vmem>>, vector<64x384xbf16>
    %cst = arith.constant dense<0.000000e+00> : vector<16x384xf32>
    %5 = tpu.matmul %3, %4, %cst {dimension_numbers = #tpu.dot_dimension_numbers<[1], [0], [0], [1], [0, 0, 1, 1], [], []>} : vector<16x64xbf16>, vector<64x384xbf16>, vector<16x384xf32> -> vector<16x384xf32>
    %c0_4 = arith.constant 0 : index
    %c0_5 = arith.constant 0 : index
    %6 = vector.load %arg4[%c0_4, %c0_5] : memref<1x384xf32, #tpu.memory_space<vmem>>, vector<1x384xf32>
    %7 = vector.broadcast %6 : vector<1x384xf32> to vector<16x384xf32>
    %8 = arith.addf %5, %7 : vector<16x384xf32>
    %c0_6 = arith.constant 0 : index
    %c0_7 = arith.constant 0 : index
    %9 = vector.load %arg5[%c0_6, %c0_7] : memref<16x384xf32, #tpu.memory_space<vmem>>, vector<16x384xf32>
    tpu.vector_store %arg5[%c0_6, %c0_7], %8 {strides = array<i32>} : memref<16x384xf32, #tpu.memory_space<vmem>>, vector<16x384xf32>,
    %c0_8 = arith.constant 0 : index
    %c0_9 = arith.constant 0 : index
    %10 = vector.load %arg7[%c0_8, %c0_9] : memref<16x1xf32, #tpu.memory_space<vmem>>, vector<16x1xf32>
    %cst_10 = arith.constant dense<0xFF800000> : vector<16xf32>
    %11 = vector.multi_reduction <maximumf>, %8, %cst_10 [1] : vector<16x384xf32> to vector<16xf32>
    %12 = vector.shape_cast %11 : vector<16xf32> to vector<16x1xf32>
    %13 = arith.maximumf %10, %12 : vector<16x1xf32>
    %14 = arith.subf %10, %13 : vector<16x1xf32>
    %15 = math.exp %14 : vector<16x1xf32>
    %c0_11 = arith.constant 0 : index
    %c0_12 = arith.constant 0 : index
    %16 = vector.load %arg8[%c0_11, %c0_12] : memref<16x1xf32, #tpu.memory_space<vmem>>, vector<16x1xf32>
    %17 = arith.mulf %15, %16 : vector<16x1xf32>
    %18 = vector.broadcast %13 : vector<16x1xf32> to vector<16x384xf32>
    %19 = arith.subf %8, %18 : vector<16x384xf32>
    %20 = math.exp %19 : vector<16x384xf32>
    %cst_13 = arith.constant dense<0.000000e+00> : vector<16xf32>
    %21 = vector.multi_reduction <add>, %20, %cst_13 [1] : vector<16x384xf32> to vector<16xf32>
    %22 = vector.shape_cast %21 : vector<16xf32> to vector<16x1xf32>
    %23 = arith.addf %17, %22 : vector<16x1xf32>
    %c0_14 = arith.constant 0 : index
    %c0_15 = arith.constant 0 : index
    %24 = vector.load %arg8[%c0_14, %c0_15] : memref<16x1xf32, #tpu.memory_space<vmem>>, vector<16x1xf32>
    tpu.vector_store %arg8[%c0_14, %c0_15], %23 {strides = array<i32>} : memref<16x1xf32, #tpu.memory_space<vmem>>, vector<16x1xf32>,
    %c0_16 = arith.constant 0 : index
    %c0_17 = arith.constant 0 : index
    %25 = vector.load %arg7[%c0_16, %c0_17] : memref<16x1xf32, #tpu.memory_space<vmem>>, vector<16x1xf32>
    tpu.vector_store %arg7[%c0_16, %c0_17], %13 {strides = array<i32>} : memref<16x1xf32, #tpu.memory_space<vmem>>, vector<16x1xf32>,
    %c0_i32_18 = arith.constant 0 : i32
    %26 = arith.cmpi eq, %arg1, %c0_i32_18 : i32
    %27 = arith.extui %26 : i1 to i32
    %c0_i32_19 = arith.constant 0 : i32
    %28 = arith.cmpi ne, %27, %c0_i32_19 : i32
    scf.if %28 {
      %c0_20 = arith.constant 0 : index
      %c0_21 = arith.constant 0 : index
      %29 = vector.load %arg7[%c0_20, %c0_21] : memref<16x1xf32, #tpu.memory_space<vmem>>, vector<16x1xf32>
      %c0_22 = arith.constant 0 : index
      %c0_23 = arith.constant 0 : index
      %30 = vector.load %arg8[%c0_22, %c0_23] : memref<16x1xf32, #tpu.memory_space<vmem>>, vector<16x1xf32>
      %31 = math.log %30 : vector<16x1xf32>
      %32 = arith.addf %29, %31 : vector<16x1xf32>
      %c0_24 = arith.constant 0 : index
      %c0_25 = arith.constant 0 : index
      %33 = vector.load %arg6[%c0_24, %c0_25] : memref<16x1xf32, #tpu.memory_space<vmem>>, vector<16x1xf32>
      tpu.vector_store %arg6[%c0_24, %c0_25], %32 {strides = array<i32>} : memref<16x1xf32, #tpu.memory_space<vmem>>, vector<16x1xf32>,
    } else {
    }
    return
  }
  func.func @transform_0(%arg0: i32, %arg1: i32) -> (i32, i32) {
    %c0_i32 = arith.constant 0 : i32
    %c0_i32_0 = arith.constant 0 : i32
    return %arg0, %c0_i32 : i32, i32
  }
  func.func @transform_1(%arg0: i32, %arg1: i32) -> (i32, i32) {
    %c0_i32 = arith.constant 0 : i32
    %c0_i32_0 = arith.constant 0 : i32
    return %c0_i32, %arg1 : i32, i32
  }
  func.func @transform_2(%arg0: i32, %arg1: i32) -> (i32, i32) {
    %c0_i32 = arith.constant 0 : i32
    %c0_i32_0 = arith.constant 0 : i32
    return %c0_i32, %arg1 : i32, i32
  }
  func.func @transform_3(%arg0: i32, %arg1: i32) -> (i32, i32) {
    %c0_i32 = arith.constant 0 : i32
    return %arg0, %arg1 : i32, i32
  }
  func.func @transform_4(%arg0: i32, %arg1: i32) -> (i32, i32) {
    %c0_i32 = arith.constant 0 : i32
    %c0_i32_0 = arith.constant 0 : i32
    return %arg0, %c0_i32 : i32, i32
  }
}

</mosaic_0001>

<bundles_post_ra>
// kernel: incremental_decoder_forward.1
= control target key start
LH: loop header
LB: loop body
LE: loop exit
PB: predicated region body
PF: predicated region fallthrough
CT: control target
= control target key end

     0   :  { %vm121_vm0 = vcmask 523264   ;;  %vm21_vm1 = vcmask 7168   ;;  %v354_v37 = vmov -inf   ;;  %v355_v58 = vmov 0   ;;  %s494_s1 = inlined_call_operand.vmem [shape: bf16[64,384], index: 1, kind: input, shape index: {}]   ;;  %s495_s0 = inlined_call_operand.vmem [shape: bf16[16,64], index: 0, kind: input, shape index: {}]   ;;  %s496_s2 = inlined_call_operand.vmem [shape: f32[1,384], index: 2, kind: input, shape index: {}]   ;;  %s497_s3 = inlined_call_operand.vmem [shape: f32[16,384], index: 3, kind: output, shape index: {0}]   ;;  %s498_s4 = inlined_call_operand.vmem [shape: f32[16,1], index: 4, kind: output, shape index: {1}]  }
   0x1   :  { %v303_v0 = vld [vmem:[%s494_s1 + $0x48] sm:$0xf]  ;;  %v327_v1 = vld [vmem:[%s494_s1 + $0x50] sm:$0xf0]  ;;  %v326_v2 = vld [vmem:[%s494_s1 + $0x4c] sm:$0xf]  ;;  %332 = vset.pattern.permute.xlu1 %v355_v58  ;;  %333 = vset.pattern.permute.xlu0 %v355_v58 }
   0x2   :  { %v304_v3 = vor.u32 %v327_v1, %v303_v0  ;;  %v305_v4 = vld [vmem:[%s494_s1 + $0x54] sm:$0xf0]  ;;  %v311_v5 = vld [vmem:[%s494_s1 + $0x50] sm:$0xf]  ;;  %v328_v6 = vld [vmem:[%s494_s1 + $0x58] sm:$0xf0] }
   0x3   :  { %v308_v7 = vor.u32 %v326_v2, %v305_v4  ;;  %v312_v8 = vor.u32 %v328_v6, %v311_v5  ;;  %v291_v9 = vld [vmem:[%s494_s1 + $0x30] sm:$0xf]  ;;  %v324_v10 = vld [vmem:[%s494_s1 + $0x38] sm:$0xf0]  ;;  %v323_v11 = vld [vmem:[%s494_s1 + $0x34] sm:$0xf] }
   0x4   :  { %129 = vmatpush.bf16.msra.mxu0 %v304_v3  ;;  %v292_v12 = vor.u32 %v324_v10, %v291_v9  ;;  %v293_v13 = vld [vmem:[%s494_s1 + $0x3c] sm:$0xf0]  ;;  %v299_v14 = vld [vmem:[%s494_s1 + $0x38] sm:$0xf]  ;;  %v325_v15 = vld [vmem:[%s494_s1 + $0x40] sm:$0xf0] }
   0x5   :  { %143 = vmatpush.bf16.msra.mxu1 %v308_v7  ;;  %157 = vmatpush.bf16.msra.mxu2 %v312_v8  ;;  %v296_v16 = vor.u32 %v323_v11, %v293_v13  ;;  %v300_v17 = vor.u32 %v325_v15, %v299_v14  ;;  %v279_v18 = vld [vmem:[%s494_s1 + $0x18] sm:$0xf]  ;;  %v321_v19 = vld [vmem:[%s494_s1 + $0x20] sm:$0xf0]  ;;  %v320_v20 = vld [vmem:[%s494_s1 + $0x1c] sm:$0xf] }
   0x6   :  { %v281_v21 = vld [vmem:[%s494_s1 + $0x24] sm:$0xf0]  ;;  %v287_v22 = vld [vmem:[%s494_s1 + $0x20] sm:$0xf]  ;;  %v322_v23 = vld [vmem:[%s494_s1 + $0x28] sm:$0xf0]  ;;  %v280_v24 = vor.u32 %v321_v19, %v279_v18 }
   0x7   :  { %v284_v25 = vor.u32 %v320_v20, %v281_v21  ;;  %v288_v26 = vor.u32 %v322_v23, %v287_v22  ;;  %v267_v27 = vld [vmem:[%s494_s1] sm:$0xf]  ;;  %v318_v28 = vld [vmem:[%s494_s1 + $0x8] sm:$0xf0]  ;;  %v317_v29 = vld [vmem:[%s494_s1 + $0x4] sm:$0xf] }
   0x8   :  { %130 = vmatpush.bf16.msra.mxu0 %v292_v12  ;;  %v269_v30 = vld [vmem:[%s494_s1 + $0xc] sm:$0xf0]  ;;  %v275_v31 = vld [vmem:[%s494_s1 + $0x8] sm:$0xf]  ;;  %v319_v32 = vld [vmem:[%s494_s1 + $0x10] sm:$0xf0]  ;;  %v268_v33 = vor.u32 %v318_v28, %v267_v27 }
   0x9   :  { %144 = vmatpush.bf16.msra.mxu1 %v296_v16  ;;  %158 = vmatpush.bf16.msra.mxu2 %v300_v17  ;;  %v272_v34 = vor.u32 %v317_v29, %v269_v30  ;;  %v276_v35 = vor.u32 %v319_v32, %v275_v31  ;;  %v316_v36 = vld [vmem:[%s495_s0] sm:$0xff]  ;;  %22 = vst.msk [vmem:[#allocation2] sm:$0xff] %vm21_vm1, %v354_v37  ;;  %v356_v59 = vmov 0.0  }
   0xa   :  { %23 = vst.msk [vmem:[#allocation2 + $0x8] sm:$0xff] %vm21_vm1, %v354_v37  ;;  %v44_v38 = vld [vmem:[%s496_s2] sm:$0x7] }
   0xb   :  { %v46_v39 = vperm.slane %v44_v38, 0  ;;  %v47_v40 = vperm.slane %v44_v38, 1  ;;  %v48_v45 = vperm.slane %v44_v38, 2  ;;  %24 = vst.msk [vmem:[#allocation3] sm:$0xff] %vm21_vm1, %v356_v59 }
   0xc   :  { %131 = vmatpush.bf16.msra.mxu0 %v280_v24  ;;  %25 = vst.msk [vmem:[#allocation3 + $0x8] sm:$0xff] %vm21_vm1, %v356_v59 }
   0xd   :  { %145 = vmatpush.bf16.msra.mxu1 %v284_v25  ;;  %159 = vmatpush.bf16.msra.mxu2 %v288_v26 }
  0x10   :  { %132 = vmatpush.bf16.msra.mxu0 %v268_v33  ;;  %v173_v60 = vld [vmem:[#allocation2] sm:$0xff] }
  0x11   :  { %146 = vmatpush.bf16.msra.mxu1 %v272_v34  ;;  %160 = vmatpush.bf16.msra.mxu2 %v276_v35  ;;  %v174_v0 = vld [vmem:[#allocation2 + $0x8] sm:$0xff] }
  0x12   :  { %v191_v31 = vld [vmem:[#allocation3] sm:$0xff] }
  0x13   :  { %313 = vmatmul.msk.bf16.vlgmr.msra.gmra.mxu0 %vm121_vm0, %v316_v36 }
  0x14   :  { %314 = vmatmul.msk.bf16.vlgmr.msra.gmra.mxu1 %vm121_vm0, %v316_v36  ;;  %315 = vmatmul.msk.bf16.vlgmr.msra.gmra.mxu2 %vm121_vm0, %v316_v36  ;;  %v192_v36 = vld [vmem:[#allocation3 + $0x8] sm:$0xff] }
  0x90   :  { %v134_v41 = vpop.f32.mrf.mxu0 }
  0x91   :  { %v135_v42 = vadd.f32 %v134_v41, %v46_v39  ;;  %v148_v43 = vpop.f32.mrf.mxu1 }
  0x92   :  { %v149_v44 = vadd.f32 %v148_v43, %v47_v40 }
  0x93   :  { %167 = vst [vmem:[%s497_s3] sm:$0xff] %v135_v42 }
  0x94   :  { %168 = vst [vmem:[%s497_s3 + $0x8] sm:$0xff] %v149_v44 }
  0x97   :  { %v162_v46 = vpop.f32.mrf.mxu2 }
  0x98   :  { %v163_v47 = vadd.f32 %v162_v46, %v48_v45  ;;  %v136_v48 = vpop.f32.mrf.mxu0 }
  0x99   :  { %v137_v49 = vadd.f32 %v136_v48, %v46_v39  ;;  %v150_v50 = vpop.f32.mrf.mxu1 }
  0x9a   :  { %169 = vst [vmem:[%s497_s3 + $0x10] sm:$0xff] %v163_v47  ;;  %v151_v51 = vadd.f32 %v150_v50, %v47_v40  ;;  %v175_v52 = vmax.f32 %v135_v42, %v163_v47 }
  0x9b   :  { %170 = vst [vmem:[%s497_s3 + $0x18] sm:$0xff] %v137_v49 }
  0x9c   :  { %171 = vst [vmem:[%s497_s3 + $0x20] sm:$0xff] %v151_v51  ;;  %v176_v53 = vmax.f32 %v175_v52, %v149_v44 }
  0x9e   :  { %177 = vmax.xlane.f32.xlu0 %v176_v53 }
  0x9f   :  { %v164_v54 = vpop.f32.mrf.mxu2 }
  0xa0   :  { %v165_v55 = vadd.f32 %v164_v54, %v48_v45 }
  0xa2   :  { %172 = vst [vmem:[%s497_s3 + $0x28] sm:$0xff] %v165_v55  ;;  %v179_v56 = vmax.f32 %v137_v49, %v165_v55 }
  0xa4   :  { %v180_v57 = vmax.f32 %v179_v56, %v151_v51 }
  0xa6   :  { %181 = vmax.xlane.f32.xlu0 %v180_v57 }
 0x111   :  { %v178_v61 = vpop.xlane.xlu0 %177 }
 0x112   :  { %v183_v62 = vmax.f32 %v173_v60, %v178_v61 }
 0x114   :  { %v185_v63 = vsub.f32 %v173_v60, %v183_v62  ;;  %236 = vst.msk [vmem:[#allocation2] sm:$0xff] %vm21_vm1, %v183_v62  ;;  %197 = vperm.xlu1 %332, %v183_v62  }
 0x116   :  { %v187_v28 = vmul.f32 1.442695, %v185_v63 }
 0x119   :  { %v182_v1 = vpop.xlane.xlu0 %181 }
 0x11a   :  { %v184_v2 = vmax.f32 %v174_v0, %v182_v1 }
 0x11c   :  { %v186_v3 = vsub.f32 %v174_v0, %v184_v2  ;;  %237 = vst.msk [vmem:[#allocation2 + $0x8] sm:$0xff] %vm21_vm1, %v184_v2  ;;  %202 = vperm.xlu1 %332, %v184_v2  }
 0x11e   :  { %v189_v29 = vmul.f32 1.442695, %v186_v3 }
 0x123   :  { %v242_v48 = vld [vmem:[#allocation2 + $0x8] sm:$0xff] }
 0x186   :  { %v198_v4 = vpop.permute.xlu1 %197 }
 0x187   :  { %v205_v5 = vsub.f32 %v135_v42, %v198_v4  ;;  %v206_v6 = vsub.f32 %v149_v44, %v198_v4  ;;  %v207_v7 = vsub.f32 %v163_v47, %v198_v4  ;;  %v241_v44 = vld [vmem:[#allocation2] sm:$0xff] }
 0x189   :  { %v211_v8 = vmul.f32 1.442695, %v205_v5  ;;  %v213_v9 = vmul.f32 1.442695, %v206_v6  ;;  %v215_v10 = vmul.f32 1.442695, %v207_v7 }
 0x18b   :  { %334 = vpow2.f32 %v211_v8 }
 0x18c   :  { %336 = vpow2.f32 %v213_v9 }
 0x18d   :  { %338 = vpow2.f32 %v215_v10 }
 0x18e   :  { %v203_v11 = vpop.permute.xlu1 %202 }
 0x18f   :  { %v208_v12 = vsub.f32 %v137_v49, %v203_v11  ;;  %v209_v13 = vsub.f32 %v151_v51, %v203_v11  ;;  %v210_v14 = vsub.f32 %v165_v55, %v203_v11 }
 0x191   :  { %v335_v15 = vpop.eup %334  ;;  %v217_v16 = vmul.f32 1.442695, %v208_v12  ;;  %v219_v17 = vmul.f32 1.442695, %v209_v13  ;;  %v221_v19 = vmul.f32 1.442695, %v210_v14 }
 0x192   :  { %v337_v18 = vpop.eup %336 }
 0x193   :  { %340 = vpow2.f32 %v217_v16  ;;  %v223_v20 = vadd.f32 %v337_v18, %v335_v15  ;;  %v339_v21 = vpop.eup %338 }
 0x194   :  { %342 = vpow2.f32 %v219_v17 }
 0x195   :  { %v224_v22 = vadd.f32 %v339_v21, %v223_v20  ;;  %344 = vpow2.f32 %v221_v19 }
 0x196   :  { %346 = vpow2.f32 %v187_v28 }
 0x197   :  { %225 = vadd.xlane.f32.xlu2 %v224_v22  ;;  %348 = vpow2.f32 %v189_v29 }
 0x199   :  { %v341_v23 = vpop.eup %340 }
 0x19a   :  { %v343_v24 = vpop.eup %342 }
 0x19b   :  { %v227_v25 = vadd.f32 %v343_v24, %v341_v23  ;;  %v345_v26 = vpop.eup %344 }
 0x19c   :  { %v347_v30 = vpop.eup %346 }
 0x19d   :  { %v228_v27 = vadd.f32 %v345_v26, %v227_v25  ;;  %v193_v32 = vmul.f32 %v347_v30, %v191_v31  ;;  %v349_v35 = vpop.eup %348 }
 0x19e   :  { %v194_v37 = vmul.f32 %v349_v35, %v192_v36 }
 0x19f   :  { %229 = vadd.xlane.f32.xlu2 %v228_v27 }
 0x20a   :  { %v226_v33 = vpop.xlane.xlu2 %225 }
 0x20b   :  { %v231_v34 = vadd.f32 %v226_v33, %v193_v32 }
 0x20d   :  { %234 = vst.msk [vmem:[#allocation3] sm:$0xff] %vm21_vm1, %v231_v34 }
 0x212   :  { %v230_v38 = vpop.xlane.xlu2 %229 }
 0x213   :  { %v232_v39 = vadd.f32 %v230_v38, %v194_v37 }
 0x214   :  { %v243_v40 = vld [vmem:[#allocation3] sm:$0xff] }
 0x215   :  { %350 = vlog2.f32 %v243_v40  ;;  %235 = vst.msk [vmem:[#allocation3 + $0x8] sm:$0xff] %vm21_vm1, %v232_v39 }
 0x21b   :  { %v351_v41 = vpop.eup %350 }
 0x21c   :  { %v246_v42 = vmul.f32 0.6931472, %v351_v41  ;;  %v244_v43 = vld [vmem:[#allocation3 + $0x8] sm:$0xff] }
 0x21d   :  { %352 = vlog2.f32 %v244_v43 }
 0x21e   :  { %v249_v45 = vadd.f32 %v246_v42, %v241_v44 }
 0x220   :  { %251 = vst.msk [vmem:[%s498_s4] sm:$0xff] %vm21_vm1, %v249_v45 }
 0x223   :  { %v353_v46 = vpop.eup %352 }
 0x224   :  { %v248_v47 = vmul.f32 0.6931472, %v353_v46 }
 0x226   :  { %v250_v49 = vadd.f32 %v248_v47, %v242_v48 }
 0x228   :  { %252 = vst.msk [vmem:[%s498_s4 + $0x8] sm:$0xff] %vm21_vm1, %v250_v49 }

</bundles_post_ra>
